<compile_context>
chip_gen: v7x
topology: tpu7x:2x2x1
jax: 0.10.0
libtpu: 0.0.40
codegen_flags: <defaults>
</compile_context>

<pallas_src>
import jax
import jax.numpy as jnp
from jax.experimental import pallas as pl
from jax.experimental.pallas import tpu as pltpu


# ---------------------------------------------------------------------------
# Table setup (equivalent of compute_freq_cis) — plain JAX, runs once at init.
#   cos_rep[p, 2i] = cos_rep[p, 2i+1] = cos(p * inv_freq[i])
#   sin_sgn[p, 2i] = -sin(p * inv_freq[i]),  sin_sgn[p, 2i+1] = +sin(...)
# so that  out = x * cos_rep + swap_pairs(x) * sin_sgn  implements
# (xr + i*xi) * (cos + i*sin) on interleaved (real, imag) lane pairs.
# ---------------------------------------------------------------------------
def compute_rope_tables(dim: int, end: int, theta: float = 10000.0):
    assert dim % 2 == 0, "head_dim must be even for RoPE"
    half = dim // 2
    inv_freq = 1.0 / theta ** (jnp.arange(0, dim, 2)[:half].astype(jnp.float32) / dim)
    t = jnp.arange(end, dtype=jnp.float32)
    freqs = jnp.outer(t, inv_freq)                                   # [end, dim//2]
    cos, sin = jnp.cos(freqs), jnp.sin(freqs)
    cos_rep = jnp.repeat(cos, 2, axis=-1)                            # [c0,c0,c1,c1,...]
    sin_sgn = jnp.stack([-sin, sin], axis=-1).reshape(end, dim)      # [-s0,+s0,-s1,+s1,...]
    return cos_rep, sin_sgn


# ---------------------------------------------------------------------------
# Pallas kernel. Block shapes (batch dim squeezed out of q/k blocks):
#   cos_ref, sin_ref : (TS, H*head_dim)   float32   (pre-expanded across heads)
#   q_ref, k_ref     : (TS, H*head_dim)   native dtype
#   qo_ref, ko_ref   : (TS, H*head_dim)   native dtype
# ---------------------------------------------------------------------------
def _rope_kernel(cos_ref, sin_ref, q_ref, k_ref, qo_ref, ko_ref):
    hd = q_ref.shape[-1]

    # (1, hd) lane-parity selector: for lane j we need its interleaved
    # (real, imag) partner j ^ 1.  Roll a 1-row lane iota with the same
    # primitive and pick, per lane, whichever of roll(x, +1) / roll(x, -1)
    # actually carries the partner -> robust to roll direction convention,
    # at negligible cost (single-row iota/roll/compare).
    lane = jax.lax.broadcasted_iota(jnp.int32, (1, hd), 1)
    take_a = pltpu.roll(lane, 1, axis=1) == (lane ^ 1)

    cos = cos_ref[...]
    sin = sin_ref[...]

    def rotate(x_ref, o_ref):
        x = x_ref[...]                                # stay in native dtype
        x_a = pltpu.roll(x, 1, axis=1)                # native-dtype XLU rolls
        x_b = pltpu.roll(x, hd - 1, axis=1)
        x_swap = jnp.where(take_a, x_a, x_b)          # x_swap[:, j] == x[:, j ^ 1]
        o_ref[...] = (x.astype(jnp.float32) * cos
                      + x_swap.astype(jnp.float32) * sin).astype(o_ref.dtype)

    rotate(q_ref, qo_ref)
    rotate(k_ref, ko_ref)


def _choose_seq_tile(seq_len: int, lane_width: int, itemsize: int, batch: int,
                     target_bytes: int = 1 << 20, max_tile: int = 1024) -> int:
    """Seq tile so each q/k block is ~<=1 MiB (safe on v7x 64 MiB VMEM)."""
    # Packed-sublane granule: 32 rows for 1-byte dtypes, 16 for bf16, 8 for f32.
    granule = 32 if itemsize == 1 else (16 if itemsize == 2 else 8)
    ts = max(granule, target_bytes // max(1, lane_width * itemsize))
    ts = min(ts, max_tile, seq_len)
    if ts < seq_len:
        ts = max(granule, (ts // granule) * granule)   # keep (8,128) rule happy
    # v7x has 2 TensorCores sharing 'parallel' grid axes: make sure there are
    # at least 2 grid steps when the sequence is long enough to split.
    if batch * pl.cdiv(seq_len, ts) < 2 and seq_len >= 2 * granule:
        ts = max(granule, (pl.cdiv(seq_len, 2) // granule) * granule)
        while ts >= seq_len:
            ts -= granule
        ts = max(ts, granule)
    return min(ts, seq_len)


def _vmem_limit_bytes(ts: int, hd: int, itemsize: int) -> int:
    io = 4 * 2 * ts * hd * itemsize        # q,k in + q,k out, double-buffered
    tab = 2 * 2 * ts * hd * 4              # cos,sin f32 blocks, double-buffered
    interm = 4 * ts * hd * 4               # f32 temporaries inside the body
    est = io + tab + interm + (4 << 20)    # headroom
    return int(min(max(est, 32 << 20), 56 << 20))


@jax.jit
def apply_rope_pallas(q, k, cos_hd, sin_hd):
    """
    q, k              : [bs, seq_len, num_heads, head_dim]
    cos_hd, sin_hd    : [seq_len, num_heads*head_dim] (float32, pre-expanded)
    returns q_out, k_out with the same shape/dtype as q, k.
    """
    bs, seq_len, num_heads, head_dim = q.shape
    assert head_dim % 2 == 0, "head_dim must be even for RoPE"
    hd = num_heads * head_dim
    assert cos_hd.shape == (seq_len, hd) and sin_hd.shape == (seq_len, hd)

    # Heads collapse into the lane axis (free reshape of contiguous dims).
    q2 = q.reshape(bs, seq_len, hd)
    k2 = k.reshape(bs, seq_len, hd)

    itemsize = max(q.dtype.itemsize, k.dtype.itemsize)
    ts = _choose_seq_tile(seq_len, hd, itemsize, bs)
    num_s_tiles = pl.cdiv(seq_len, ts)

    # Grid: seq tiles outer, batch inner -> the table block index is constant
    # across consecutive batch steps, so Pallas skips its re-copy.
    qk_spec = pl.BlockSpec((None, ts, hd), lambda s, b: (b, s, 0))
    tab_spec = pl.BlockSpec((ts, hd), lambda s, b: (s, 0))

    qo, ko = pl.pallas_call(
        _rope_kernel,
        out_shape=(jax.ShapeDtypeStruct((bs, seq_len, hd), q.dtype),
                   jax.ShapeDtypeStruct((bs, seq_len, hd), k.dtype)),
        grid_spec=pltpu.PrefetchScalarGridSpec(
            num_scalar_prefetch=0,
            grid=(num_s_tiles, bs),
            in_specs=[tab_spec, tab_spec, qk_spec, qk_spec],
            out_specs=[qk_spec, qk_spec],
        ),
        compiler_params=pltpu.CompilerParams(
            dimension_semantics=("parallel", "parallel"),
            vmem_limit_bytes=_vmem_limit_bytes(ts, hd, itemsize)),
    )(cos_hd, sin_hd, q2, k2)

    return (qo.reshape(bs, seq_len, num_heads, head_dim),
            ko.reshape(bs, seq_len, num_heads, head_dim))


class ROPE1D:
    """JAX/Pallas equivalent of the PyTorch ROPE1D module (forward only)."""

    def __init__(self, dim: int, max_position: int, theta: float = 10000.0):
        self.dim = dim
        self.max_position = max_position
        self.cos_base, self.sin_base = compute_rope_tables(dim, max_position, theta)
        self._expanded = {}   # num_heads -> (cos [S, H*dim], sin [S, H*dim])

    def _tables(self, num_heads: int):
        t = self._expanded.get(num_heads)
        if t is None:
            cos = jnp.tile(self.cos_base, (1, num_heads))
            sin = jnp.tile(self.sin_base, (1, num_heads))
            t = (cos, sin)
            self._expanded[num_heads] = t
        return t

    def __call__(self, q, k):
        bs, seq_len, num_heads, head_dim = q.shape
        assert head_dim == self.dim and seq_len <= self.max_position
        cos, sin = self._tables(num_heads)
        return apply_rope_pallas(q, k, cos[:seq_len], sin[:seq_len])


# ---------------------------------------------------------------------------
# Pure-JAX reference (mirrors the torch complex math) for sanity checks.
# ---------------------------------------------------------------------------
def _rope_reference(q, k, dim: int, theta: float = 10000.0):
    seq_len = q.shape[1]
    half = dim // 2
    inv_freq = 1.0 / theta ** (jnp.arange(0, dim, 2)[:half].astype(jnp.float32) / dim)
    t = jnp.arange(seq_len, dtype=jnp.float32)
    freqs = jnp.outer(t, inv_freq)
    cos, sin = jnp.cos(freqs), jnp.sin(freqs)

    def rot(x):
        xf = x.astype(jnp.float32)
        xr, xi = xf[..., 0::2], xf[..., 1::2]
        c = cos[None, :, None, :]
        s = sin[None, :, None, :]
        outr = xr * c - xi * s
        outi = xr * s + xi * c
        return jnp.stack([outr, outi], axis=-1).reshape(x.shape).astype(x.dtype)

    return rot(q), rot(k)


if __name__ == "__main__":
    key = jax.random.PRNGKey(0)
    kq, kk, kq2, kk2 = jax.random.split(key, 4)

    # --- small f32 test, shapes consistent with the module -------------------
    bs, seq_len, num_heads, head_dim = 2, 8, 4, 32
    max_position = 16
    q = jax.random.normal(kq, (bs, seq_len, num_heads, head_dim), dtype=jnp.float32)
    k = jax.random.normal(kk, (bs, seq_len, num_heads, head_dim), dtype=jnp.float32)

    rope = ROPE1D(head_dim, max_position)
    q_out, k_out = rope(q, k)
    jax.block_until_ready((q_out, k_out))

    q_ref, k_ref = _rope_reference(q, k, head_dim)
    assert q_out.shape == q.shape and q_out.dtype == q.dtype
    assert jnp.allclose(q_out, q_ref, atol=1e-5, rtol=1e-5)
    assert jnp.allclose(k_out, k_ref, atol=1e-5, rtol=1e-5)

    # --- bf16 test exercising lane-dense tables + tiling path ----------------
    bs2, seq2, heads2, dim2 = 2, 1024, 8, 64
    qb = jax.random.normal(kq2, (bs2, seq2, heads2, dim2), dtype=jnp.float32).astype(jnp.bfloat16)
    kb = jax.random.normal(kk2, (bs2, seq2, heads2, dim2), dtype=jnp.float32).astype(jnp.bfloat16)
    rope2 = ROPE1D(dim2, seq2)
    qb_out, kb_out = rope2(qb, kb)
    jax.block_until_ready((qb_out, kb_out))

    qb_ref, kb_ref = _rope_reference(qb, kb, dim2)
    assert qb_out.dtype == jnp.bfloat16 and kb_out.dtype == jnp.bfloat16
    assert jnp.allclose(qb_out.astype(jnp.float32), qb_ref.astype(jnp.float32),
                        atol=2e-2, rtol=2e-2)
    assert jnp.allclose(kb_out.astype(jnp.float32), kb_ref.astype(jnp.float32),
                        atol=2e-2, rtol=2e-2)

    print("KERNEL_OK")
</pallas_src>

<mosaic_0001>
module attributes {stable_mosaic.version = 11 : i64} {
  func.func @_rope_kernel(%arg0: i32, %arg1: i32, %arg2: memref<8x128xf32, #tpu.memory_space<vmem>>, %arg3: memref<8x128xf32, #tpu.memory_space<vmem>>, %arg4: memref<1x8x128xf32, #tpu.memory_space<vmem>>, %arg5: memref<1x8x128xf32, #tpu.memory_space<vmem>>, %arg6: memref<1x8x128xf32, #tpu.memory_space<vmem>>, %arg7: memref<1x8x128xf32, #tpu.memory_space<vmem>>) attributes {dimension_semantics = [#tpu.dimension_semantics<parallel>, #tpu.dimension_semantics<parallel>], iteration_bounds = array<i64: 1, 2>, scalar_prefetch = 0 : i64, scratch_operands = 0 : i64, tpu.core_type = #tpu.core_type<tc>, window_params = [{transform_indices = @transform_0, window_bounds = array<i64: 8, 128>}, {transform_indices = @transform_1, window_bounds = array<i64: 8, 128>}, {transform_indices = @transform_2, window_bounds = array<i64: 1, 8, 128>}, {transform_indices = @transform_3, window_bounds = array<i64: 1, 8, 128>}, {transform_indices = @transform_4, window_bounds = array<i64: 1, 8, 128>}, {transform_indices = @transform_5, window_bounds = array<i64: 1, 8, 128>}]} {
    %0 = tpu.iota {dimensions = array<i32: 1>} : vector<1x128xi32>
    %c1_i32 = arith.constant 1 : i32
    %1 = tpu.dynamic_rotate %0 by %c1_i32 dim 1 : vector<1x128xi32>, i32 -> vector<1x128xi32>
    %c1_i32_0 = arith.constant 1 : i32
    %2 = vector.broadcast %c1_i32_0 : i32 to vector<1x128xi32>
    %3 = arith.xori %0, %2 : vector<1x128xi32>
    %4 = arith.cmpi eq, %1, %3 : vector<1x128xi32>
    %c0 = arith.constant 0 : index
    %c0_1 = arith.constant 0 : index
    %5 = vector.load %arg2[%c0, %c0_1] : memref<8x128xf32, #tpu.memory_space<vmem>>, vector<8x128xf32>
    %c0_2 = arith.constant 0 : index
    %c0_3 = arith.constant 0 : index
    %6 = vector.load %arg3[%c0_2, %c0_3] : memref<8x128xf32, #tpu.memory_space<vmem>>, vector<8x128xf32>
    %c0_4 = arith.constant 0 : index
    %c0_5 = arith.constant 0 : index
    %c0_6 = arith.constant 0 : index
    %7 = vector.load %arg4[%c0_4, %c0_5, %c0_6] : memref<1x8x128xf32, #tpu.memory_space<vmem>>, vector<1x8x128xf32>
    %8 = vector.shape_cast %7 : vector<1x8x128xf32> to vector<8x128xf32>
    %c1_i32_7 = arith.constant 1 : i32
    %9 = tpu.dynamic_rotate %8 by %c1_i32_7 dim 1 : vector<8x128xf32>, i32 -> vector<8x128xf32>
    %c127_i32 = arith.constant 127 : i32
    %10 = tpu.dynamic_rotate %8 by %c127_i32 dim 1 : vector<8x128xf32>, i32 -> vector<8x128xf32>
    %11 = vector.shape_cast %4 : vector<1x128xi1> to vector<1x128xi1>
    %12 = vector.broadcast %11 : vector<1x128xi1> to vector<8x128xi1>
    %13 = arith.select %12, %9, %10 : vector<8x128xi1>, vector<8x128xf32>
    %14 = arith.mulf %8, %5 : vector<8x128xf32>
    %15 = arith.mulf %13, %6 : vector<8x128xf32>
    %16 = arith.addf %14, %15 : vector<8x128xf32>
    %c0_8 = arith.constant 0 : index
    %c0_9 = arith.constant 0 : index
    %c0_10 = arith.constant 0 : index
    %17 = vector.load %arg6[%c0_8, %c0_9, %c0_10] : memref<1x8x128xf32, #tpu.memory_space<vmem>>, vector<1x8x128xf32>
    %18 = vector.shape_cast %17 : vector<1x8x128xf32> to vector<8x128xf32>
    %19 = vector.shape_cast %16 : vector<8x128xf32> to vector<1x8x128xf32>
    tpu.vector_store %arg6[%c0_8, %c0_9, %c0_10], %19 {strides = array<i32>} : memref<1x8x128xf32, #tpu.memory_space<vmem>>, vector<1x8x128xf32>,
    %c0_11 = arith.constant 0 : index
    %c0_12 = arith.constant 0 : index
    %c0_13 = arith.constant 0 : index
    %20 = vector.load %arg5[%c0_11, %c0_12, %c0_13] : memref<1x8x128xf32, #tpu.memory_space<vmem>>, vector<1x8x128xf32>
    %21 = vector.shape_cast %20 : vector<1x8x128xf32> to vector<8x128xf32>
    %c1_i32_14 = arith.constant 1 : i32
    %22 = tpu.dynamic_rotate %21 by %c1_i32_14 dim 1 : vector<8x128xf32>, i32 -> vector<8x128xf32>
    %c127_i32_15 = arith.constant 127 : i32
    %23 = tpu.dynamic_rotate %21 by %c127_i32_15 dim 1 : vector<8x128xf32>, i32 -> vector<8x128xf32>
    %24 = vector.shape_cast %4 : vector<1x128xi1> to vector<1x128xi1>
    %25 = vector.broadcast %24 : vector<1x128xi1> to vector<8x128xi1>
    %26 = arith.select %25, %22, %23 : vector<8x128xi1>, vector<8x128xf32>
    %27 = arith.mulf %21, %5 : vector<8x128xf32>
    %28 = arith.mulf %26, %6 : vector<8x128xf32>
    %29 = arith.addf %27, %28 : vector<8x128xf32>
    %c0_16 = arith.constant 0 : index
    %c0_17 = arith.constant 0 : index
    %c0_18 = arith.constant 0 : index
    %30 = vector.load %arg7[%c0_16, %c0_17, %c0_18] : memref<1x8x128xf32, #tpu.memory_space<vmem>>, vector<1x8x128xf32>
    %31 = vector.shape_cast %30 : vector<1x8x128xf32> to vector<8x128xf32>
    %32 = vector.shape_cast %29 : vector<8x128xf32> to vector<1x8x128xf32>
    tpu.vector_store %arg7[%c0_16, %c0_17, %c0_18], %32 {strides = array<i32>} : memref<1x8x128xf32, #tpu.memory_space<vmem>>, vector<1x8x128xf32>,
    return
  }
  func.func @transform_0(%arg0: i32, %arg1: i32) -> (i32, i32) {
    %c0_i32 = arith.constant 0 : i32
    %c0_i32_0 = arith.constant 0 : i32
    return %arg0, %c0_i32 : i32, i32
  }
  func.func @transform_1(%arg0: i32, %arg1: i32) -> (i32, i32) {
    %c0_i32 = arith.constant 0 : i32
    %c0_i32_0 = arith.constant 0 : i32
    return %arg0, %c0_i32 : i32, i32
  }
  func.func @transform_2(%arg0: i32, %arg1: i32) -> (i32, i32, i32) {
    %c0_i32 = arith.constant 0 : i32
    %c0_i32_0 = arith.constant 0 : i32
    return %arg1, %arg0, %c0_i32 : i32, i32, i32
  }
  func.func @transform_3(%arg0: i32, %arg1: i32) -> (i32, i32, i32) {
    %c0_i32 = arith.constant 0 : i32
    %c0_i32_0 = arith.constant 0 : i32
    return %arg1, %arg0, %c0_i32 : i32, i32, i32
  }
  func.func @transform_4(%arg0: i32, %arg1: i32) -> (i32, i32, i32) {
    %c0_i32 = arith.constant 0 : i32
    %c0_i32_0 = arith.constant 0 : i32
    return %arg1, %arg0, %c0_i32 : i32, i32, i32
  }
  func.func @transform_5(%arg0: i32, %arg1: i32) -> (i32, i32, i32) {
    %c0_i32 = arith.constant 0 : i32
    %c0_i32_0 = arith.constant 0 : i32
    return %arg1, %arg0, %c0_i32 : i32, i32, i32
  }
}

</mosaic_0001>

<bundles_post_ra>
// kernel: apply_rope_pallas.1
= control target key start
LH: loop header
LB: loop body
LE: loop exit
PB: predicated region body
PF: predicated region fallthrough
CT: control target
= control target key end

     0   :  { %s624_s18 = smov 0   ;;  %s626_s19 = smov 0   ;;  %s675_s0 = inlined_call_operand.vmem [shape: f32[8,128], index: 0, kind: input, shape index: {}]   ;;  %s676_s1 = inlined_call_operand.vmem [shape: f32[8,128], index: 1, kind: input, shape index: {}]   ;;  %s677_s2 = inlined_call_operand.vmem [shape: f32[2,8,128], index: 2, kind: input, shape index: {}]   ;;  %s678_s3 = inlined_call_operand.vmem [shape: f32[2,8,128], index: 3, kind: input, shape index: {}]   ;;  %s679_s4 = inlined_call_operand.vmem [shape: f32[2,8,128], index: 4, kind: output, shape index: {0}]   ;;  %s680_s5 = inlined_call_operand.vmem [shape: f32[2,8,128], index: 5, kind: output, shape index: {1}]  }
   0x1   :  { %s628_s20 = smov 0  }
   0x2 LB: > { %s25_s21 = sadd.s32 1, %s585_s19  ;;  %p533_p0 = scmp.ge.s32.totalorder %s589_s20, 1  ;;  %s589_s20 = sphi %s628_s20, %s16_s20   ;;  %s585_s19 = sphi %s626_s19, %s682_s19   ;;  %s581_s18 = sphi %s624_s18, %s681_s18  }
   0x3   : > { %p26_p1 = scmp.ge.s32.totalorder %s25_s21, 2  ;;  %p242_p2 = scmp.lt.s32.totalorder %s589_s20, 3 }
   0x5   : > { %s684_s21 = smov (%p26_p1, %s25_s21), 0  ;;  %p243_p3 = pnand %p533_p0, %p242_p2 }
   0x6   : > { %v332_v0 = vlaneseq (!%p243_p3)  ;;  %p304_p4 = scmp.lt.s32.totalorder (!%p243_p3), %s581_s18, 1  ;;  %s591_s22 = smov (!%p243_p3), 1   ;;  %v338_v8 = vld [vmem:[%s675_s0] sm:$0xff] (!%p243_p3)  ;;  %v593_v9 = vmov (!%p243_p3), 0  }
   0x7   : > { %246 = sbr.rel (%p243_p3) target bundleno = 143 (0x8f), region = 36  ;;  %s592_s30 = smov (!%p243_p3), 127   ;;  %v339_v13 = vld [vmem:[%s676_s1] sm:$0xff] (!%p243_p3) }
   0x8   : > { %v333_v1 = vand.u32 (!%p243_p3), 127, %v332_v0  ;;  %v347_v4 = vshrl.u32 (!%p243_p3), %v332_v0, 7 }
   0xa   : > { %334 = vrot.lane.b32.xlu0 (!%p243_p3), %v333_v1, %s591_s22  ;;  %v336_v5 = vxor.u32 (!%p243_p3), 1, %v333_v1  ;;  %v348_v6 = vsub.s32 (!%p243_p3), 0, %v347_v4 }
   0xe   : > { %s686_s18 = smov (!%p304_p4, %s581_s18), 1 }
   0xf   : > { %s642_s23 = sshll.u32 %s686_s18, 3 }
  0x10   : > { %s310_s26 = scalar_lea.vmem %s677_s2, %s642_s23  ;;  %s317_s29 = scalar_lea.vmem %s678_s3, %s642_s23 }
  0x11   : > { %v340_v2 = vld [vmem:[%s310_s26] sm:$0xff]  ;;  %s324_s12 = scalar_lea.vmem %s679_s4, %s642_s23  ;;  %s331_s15 = scalar_lea.vmem %s680_s5, %s642_s23 }
  0x12   : > { %343 = vrot.lane.b32.xlu1 %v340_v2, %s592_s30  ;;  %341 = vrot.lane.b32.xlu0 %v340_v2, %s591_s22  ;;  %v356_v3 = vld [vmem:[%s317_s29] sm:$0xff]  ;;  %v352_v15 = vmul.f32 %v340_v2, %v338_v8 }
  0x13   : > { %v362_v19 = vmul.f32 %v356_v3, %v338_v8 }
  0x16   : > { %357 = vrot.lane.b32.xlu1 %v356_v3, %s591_s22  ;;  %359 = vrot.lane.b32.xlu0 %v356_v3, %s592_s30 }
  0x7c   : > { %v335_v7 = vpop.permute.xlu0 %334 }
  0x7d   : > { %vm337_vm0 = vcmp.eq.s32.totalorder %v335_v7, %v336_v5 }
  0x7e   : > { %v345_v10 = vsel %vm337_vm0, 1, %v593_v9 }
  0x7f   : > { %v349_v11 = vrot.slane %v345_v10, %v348_v6 }
  0x81   : > { %vm350_vm1 = vcmp.eq.s32.totalorder %v349_v11, 1 }
  0x84   : > { %v344_v12 = vpop.permute.xlu1 %343  ;;  %v342_v14 = vpop.permute.xlu0 %341 }
  0x85   : > { %v351_v16 = vsel %vm350_vm1, %v342_v14, %v344_v12 }
  0x86   : > { %v353_v17 = vmul.f32 %v351_v16, %v339_v13 }
  0x88   : > { %v358_v18 = vpop.permute.xlu1 %357  ;;  %v360_v20 = vpop.permute.xlu0 %359  ;;  %v354_v21 = vadd.f32 %v353_v17, %v352_v15 }
  0x89   : > { %v361_v22 = vsel %vm350_vm1, %v358_v18, %v360_v20 }
  0x8a   : > { %v363_v23 = vmul.f32 %v361_v22, %v339_v13  ;;  %355 = vst [vmem:[%s324_s12] sm:$0xff] %v354_v21 }
  0x8c   : > { %v364_v24 = vadd.f32 %v363_v23, %v362_v19 }
  0x8e   : > { %365 = vst [vmem:[%s331_s15] sm:$0xff] %v364_v24 }
  0x8f PF: > { %s16_s20 = sadd.s32 1, %s589_s20   ;;  %s681_s18 = smov %s585_s19 }
  0x90   : > { %p13_p5 = scmp.ge.s32.totalorder %s16_s20, 4   ;;  %s682_s19 = smov %s684_s21 }
  0x92   :  { %15 = sbr.rel (!%p13_p5) target bundleno = 2 (0x2), region = 87 }

</bundles_post_ra>
